<compile_context>
chip_gen: v7x
topology: tpu7x:2x2x1
jax: 0.10.0
libtpu: 0.0.40
codegen_flags: <defaults>
</compile_context>

<pallas_src>
import functools

import jax
import jax.numpy as jnp
from jax.experimental import pallas as pl
from jax.experimental.pallas import tpu as pltpu


# ---------------------------------------------------------------------------
# Kernels
# ---------------------------------------------------------------------------

def _upsample_conv_kernel(x_ref, w_ref, b_ref, p_ref, o_ref, *,
                          compute_dtype, tile):
    # x_ref: (C, L)        w_ref: (4, C, C) = [W0, W1+W2, W0+W1, W2]
    # b_ref: (C, 1) f32    p_ref: (2, T, 2T) f32 selection mats (even, odd)
    # o_ref: (C, 2L)
    c, l = x_ref.shape
    x = x_ref[...].astype(compute_dtype)

    # Shifted copies of x with zero edges (conv padding=1):
    #   x_lm1[:, m] = x[:, m-1],  x_lp1[:, m] = x[:, m+1]
    zcol = jnp.zeros((c, 1), compute_dtype)
    x_lm1 = jnp.concatenate([zcol, x[:, :l - 1]], axis=1)
    x_lp1 = jnp.concatenate([x[:, 1:], zcol], axis=1)

    # Even output columns (t = 2m):  W0 @ x[m-1] + (W1+W2) @ x[m]
    # Odd  output columns (t = 2m+1): (W0+W1) @ x[m] + W2 @ x[m+1]
    even = (jnp.dot(w_ref[0], x_lm1, preferred_element_type=jnp.float32)
            + jnp.dot(w_ref[1], x, preferred_element_type=jnp.float32))
    odd = (jnp.dot(w_ref[2], x, preferred_element_type=jnp.float32)
           + jnp.dot(w_ref[3], x_lp1, preferred_element_type=jnp.float32))

    bias = b_ref[...].astype(jnp.float32)     # (C, 1), broadcasts over lanes
    pe = p_ref[0]                              # (T, 2T): column 2i   <- row i
    po = p_ref[1]                              # (T, 2T): column 2i+1 <- row i

    # Interleave even/odd into (C, 2L), one lane-dense aligned tile at a time.
    for t in range(l // tile):                 # static unroll
        ev = even[:, t * tile:(t + 1) * tile]
        od = odd[:, t * tile:(t + 1) * tile]
        out_t = (jnp.dot(ev, pe, preferred_element_type=jnp.float32)
                 + jnp.dot(od, po, preferred_element_type=jnp.float32)
                 + bias)
        o_ref[:, 2 * tile * t:2 * tile * (t + 1)] = out_t.astype(o_ref.dtype)


def _upsample_only_kernel(x_ref, r_ref, o_ref, *, tile):
    # Pure nearest-neighbor x2 upsample: out[:, 2m] = out[:, 2m+1] = x[:, m].
    # r_ref: (T, 2T) with r[i, 2i] = r[i, 2i+1] = 1 (exact replication).
    c, l = x_ref.shape
    x = x_ref[...].astype(jnp.float32)
    r = r_ref[...]
    for t in range(l // tile):                 # static unroll
        xt = x[:, t * tile:(t + 1) * tile]
        o_ref[:, 2 * tile * t:2 * tile * (t + 1)] = jnp.dot(
            xt, r, preferred_element_type=jnp.float32).astype(o_ref.dtype)


# ---------------------------------------------------------------------------
# Host-side glue
# ---------------------------------------------------------------------------

def _interleave_mats(tile):
    """(T, 2T) 0/1 matrices: Pe routes row i -> col 2i, Po -> col 2i+1."""
    rows = jnp.arange(tile)[:, None]
    cols = jnp.arange(2 * tile)[None, :]
    pe = (cols == 2 * rows).astype(jnp.float32)
    po = (cols == 2 * rows + 1).astype(jnp.float32)
    return pe, po


def _pick_tile(L):
    # Lane-dense (multiple of 128) interleave tiles when possible.
    # TODO(synk): add a ragged-tail path for large L not divisible by 128.
    return 128 if (L % 128 == 0) else L


def upsample1d(x, conv_weight=None, conv_bias=None, with_conv=True,
               compute_dtype=jnp.bfloat16):
    """x: (N, C, L).  Returns (N, C, 2L) in x.dtype.

    compute_dtype: MXU operand dtype for the conv matmuls (f32 accumulate).
    """
    N, C, L = x.shape
    two_l = 2 * L
    tile = _pick_tile(L)
    pe, po = _interleave_mats(tile)

    compiler_params = pltpu.CompilerParams(
        dimension_semantics=("parallel",),
        vmem_limit_bytes=32 * 1024 * 1024)

    if with_conv:
        assert conv_weight.shape == (C, C, 3)
        assert conv_bias.shape == (C,)
        w0 = conv_weight[:, :, 0].astype(jnp.float32)
        w1 = conv_weight[:, :, 1].astype(jnp.float32)
        w2 = conv_weight[:, :, 2].astype(jnp.float32)
        # [W0, W1+W2, W0+W1, W2] — summed taps precomputed host-side.
        w_stack = jnp.stack([w0, w1 + w2, w0 + w1, w2],
                            axis=0).astype(compute_dtype)      # (4, C, C)
        b = conv_bias.reshape(C, 1).astype(jnp.float32)          # (C, 1)
        p_stack = jnp.stack([pe, po], axis=0)                    # (2, T, 2T)

        kernel = functools.partial(_upsample_conv_kernel,
                                   compute_dtype=compute_dtype, tile=tile)
        return pl.pallas_call(
            kernel,
            out_shape=jax.ShapeDtypeStruct((N, C, two_l), x.dtype),
            grid_spec=pltpu.PrefetchScalarGridSpec(
                num_scalar_prefetch=0,
                grid=(N,),
                in_specs=[
                    pl.BlockSpec((None, C, L), lambda n: (n, 0, 0)),
                    pl.BlockSpec((4, C, C), lambda n: (0, 0, 0)),
                    pl.BlockSpec((C, 1), lambda n: (0, 0)),
                    pl.BlockSpec((2, tile, 2 * tile), lambda n: (0, 0, 0)),
                ],
                out_specs=pl.BlockSpec((None, C, two_l), lambda n: (n, 0, 0)),
            ),
            compiler_params=compiler_params,
        )(x, w_stack, b, p_stack)
    else:
        r = pe + po                                              # (T, 2T)
        kernel = functools.partial(_upsample_only_kernel, tile=tile)
        return pl.pallas_call(
            kernel,
            out_shape=jax.ShapeDtypeStruct((N, C, two_l), x.dtype),
            grid_spec=pltpu.PrefetchScalarGridSpec(
                num_scalar_prefetch=0,
                grid=(N,),
                in_specs=[
                    pl.BlockSpec((None, C, L), lambda n: (n, 0, 0)),
                    pl.BlockSpec((tile, 2 * tile), lambda n: (0, 0)),
                ],
                out_specs=pl.BlockSpec((None, C, two_l), lambda n: (n, 0, 0)),
            ),
            compiler_params=compiler_params,
        )(x, r)


# ---------------------------------------------------------------------------
# Pure-JAX reference (mirrors F.interpolate(nearest, x2) + Conv1d(k=3, pad=1))
# ---------------------------------------------------------------------------

def _reference(x, w, b, with_conv=True):
    u = jnp.repeat(x, 2, axis=-1)            # (N, C, 2L) nearest upsample
    if not with_conv:
        return u
    out = jax.lax.conv_general_dilated(
        u, w, window_strides=(1,), padding=((1, 1),),
        dimension_numbers=("NCH", "OIH", "NCH"))
    return out + b[None, :, None]


if __name__ == "__main__":
    N, C, L = 2, 4, 16

    key = jax.random.PRNGKey(0)
    kx, kw, kb = jax.random.split(key, 3)

    x = jax.random.normal(kx, (N, C, L), dtype=jnp.float32)
    conv_weight = jax.random.normal(kw, (C, C, 3), dtype=jnp.float32) * 0.1
    conv_bias = jax.random.normal(kb, (C,), dtype=jnp.float32) * 0.1

    ref = _reference(x, conv_weight, conv_bias, with_conv=True)

    # Exact f32-operand path: tight tolerance.
    out_f32 = jax.block_until_ready(
        upsample1d(x, conv_weight, conv_bias, with_conv=True,
                   compute_dtype=jnp.float32))
    assert out_f32.shape == (N, C, 2 * L)
    assert jnp.allclose(out_f32, ref, atol=1e-4, rtol=1e-4), \
        "f32 path mismatch vs reference"

    # Default bf16-operand / f32-accumulate path: looser tolerance.
    out_bf16 = jax.block_until_ready(
        upsample1d(x, conv_weight, conv_bias, with_conv=True))
    assert out_bf16.shape == (N, C, 2 * L)
    assert jnp.allclose(out_bf16, ref, atol=2e-2, rtol=2e-2), \
        "bf16 path mismatch vs reference"

    # with_conv=False: pure nearest-neighbor x2 upsample.
    out_up = jax.block_until_ready(upsample1d(x, with_conv=False))
    assert jnp.allclose(out_up, _reference(x, None, None, with_conv=False),
                        atol=1e-6, rtol=1e-6), "upsample-only mismatch"

    print("KERNEL_OK")
</pallas_src>

<mosaic_0001>
module attributes {stable_mosaic.version = 11 : i64} {
  func.func @_upsample_conv_kernel(%arg0: i32, %arg1: memref<1x4x16xf32, #tpu.memory_space<vmem>>, %arg2: memref<4x4x4xf32, #tpu.memory_space<vmem>>, %arg3: memref<4x1xf32, #tpu.memory_space<vmem>>, %arg4: memref<2x16x32xf32, #tpu.memory_space<vmem>>, %arg5: memref<1x4x32xf32, #tpu.memory_space<vmem>>) attributes {dimension_semantics = [#tpu.dimension_semantics<parallel>], iteration_bounds = array<i64: 2>, scalar_prefetch = 0 : i64, scratch_operands = 0 : i64, tpu.core_type = #tpu.core_type<tc>, window_params = [{transform_indices = @transform_0, window_bounds = array<i64: 1, 4, 16>}, {pipeline_mode = #tpu.pipeline_mode<synchronous>, transform_indices = @transform_1, window_bounds = array<i64: 4, 4, 4>}, {pipeline_mode = #tpu.pipeline_mode<synchronous>, transform_indices = @transform_2, window_bounds = array<i64: 4, 1>}, {pipeline_mode = #tpu.pipeline_mode<synchronous>, transform_indices = @transform_3, window_bounds = array<i64: 2, 16, 32>}, {transform_indices = @transform_4, window_bounds = array<i64: 1, 4, 32>}]} {
    %c0 = arith.constant 0 : index
    %c0_0 = arith.constant 0 : index
    %c0_1 = arith.constant 0 : index
    %0 = vector.load %arg1[%c0, %c0_0, %c0_1] : memref<1x4x16xf32, #tpu.memory_space<vmem>>, vector<1x4x16xf32>
    %1 = vector.shape_cast %0 : vector<1x4x16xf32> to vector<4x16xf32>
    %cst = arith.constant 0.000000e+00 : f32
    %2 = vector.broadcast %cst : f32 to vector<4x1xf32>
    %3 = vector.extract_strided_slice %1 {offsets = [0, 0], sizes = [4, 15], strides = [1, 1]} : vector<4x16xf32> to vector<4x15xf32>
    %4 = tpu.concatenate %2, %3 in 1 : vector<4x1xf32>, vector<4x15xf32> -> vector<4x16xf32>
    %5 = vector.extract_strided_slice %1 {offsets = [0, 1], sizes = [4, 15], strides = [1, 1]} : vector<4x16xf32> to vector<4x15xf32>
    %6 = tpu.concatenate %5, %2 in 1 : vector<4x15xf32>, vector<4x1xf32> -> vector<4x16xf32>
    %c0_2 = arith.constant 0 : index
    %c0_3 = arith.constant 0 : index
    %c0_4 = arith.constant 0 : index
    %7 = vector.load %arg2[%c0_2, %c0_3, %c0_4] : memref<4x4x4xf32, #tpu.memory_space<vmem>>, vector<1x4x4xf32>
    %8 = vector.shape_cast %7 : vector<1x4x4xf32> to vector<4x4xf32>
    %cst_5 = arith.constant dense<0.000000e+00> : vector<4x16xf32>
    %9 = tpu.matmul %8, %4, %cst_5 {dimension_numbers = #tpu.dot_dimension_numbers<[1], [0], [0], [1], [0, 0, 1, 1], [], []>} : vector<4x4xf32>, vector<4x16xf32>, vector<4x16xf32> -> vector<4x16xf32>
    %c1 = arith.constant 1 : index
    %c0_6 = arith.constant 0 : index
    %c0_7 = arith.constant 0 : index
    %10 = vector.load %arg2[%c1, %c0_6, %c0_7] : memref<4x4x4xf32, #tpu.memory_space<vmem>>, vector<1x4x4xf32>
    %11 = vector.shape_cast %10 : vector<1x4x4xf32> to vector<4x4xf32>
    %cst_8 = arith.constant dense<0.000000e+00> : vector<4x16xf32>
    %12 = tpu.matmul %11, %1, %cst_8 {dimension_numbers = #tpu.dot_dimension_numbers<[1], [0], [0], [1], [0, 0, 1, 1], [], []>} : vector<4x4xf32>, vector<4x16xf32>, vector<4x16xf32> -> vector<4x16xf32>
    %13 = arith.addf %9, %12 : vector<4x16xf32>
    %c2 = arith.constant 2 : index
    %c0_9 = arith.constant 0 : index
    %c0_10 = arith.constant 0 : index
    %14 = vector.load %arg2[%c2, %c0_9, %c0_10] : memref<4x4x4xf32, #tpu.memory_space<vmem>>, vector<1x4x4xf32>
    %15 = vector.shape_cast %14 : vector<1x4x4xf32> to vector<4x4xf32>
    %cst_11 = arith.constant dense<0.000000e+00> : vector<4x16xf32>
    %16 = tpu.matmul %15, %1, %cst_11 {dimension_numbers = #tpu.dot_dimension_numbers<[1], [0], [0], [1], [0, 0, 1, 1], [], []>} : vector<4x4xf32>, vector<4x16xf32>, vector<4x16xf32> -> vector<4x16xf32>
    %c3 = arith.constant 3 : index
    %c0_12 = arith.constant 0 : index
    %c0_13 = arith.constant 0 : index
    %17 = vector.load %arg2[%c3, %c0_12, %c0_13] : memref<4x4x4xf32, #tpu.memory_space<vmem>>, vector<1x4x4xf32>
    %18 = vector.shape_cast %17 : vector<1x4x4xf32> to vector<4x4xf32>
    %cst_14 = arith.constant dense<0.000000e+00> : vector<4x16xf32>
    %19 = tpu.matmul %18, %6, %cst_14 {dimension_numbers = #tpu.dot_dimension_numbers<[1], [0], [0], [1], [0, 0, 1, 1], [], []>} : vector<4x4xf32>, vector<4x16xf32>, vector<4x16xf32> -> vector<4x16xf32>
    %20 = arith.addf %16, %19 : vector<4x16xf32>
    %c0_15 = arith.constant 0 : index
    %c0_16 = arith.constant 0 : index
    %21 = vector.load %arg3[%c0_15, %c0_16] : memref<4x1xf32, #tpu.memory_space<vmem>>, vector<4x1xf32>
    %c0_17 = arith.constant 0 : index
    %c0_18 = arith.constant 0 : index
    %c0_19 = arith.constant 0 : index
    %22 = vector.load %arg4[%c0_17, %c0_18, %c0_19] : memref<2x16x32xf32, #tpu.memory_space<vmem>>, vector<1x16x32xf32>
    %23 = vector.shape_cast %22 : vector<1x16x32xf32> to vector<16x32xf32>
    %c1_20 = arith.constant 1 : index
    %c0_21 = arith.constant 0 : index
    %c0_22 = arith.constant 0 : index
    %24 = vector.load %arg4[%c1_20, %c0_21, %c0_22] : memref<2x16x32xf32, #tpu.memory_space<vmem>>, vector<1x16x32xf32>
    %25 = vector.shape_cast %24 : vector<1x16x32xf32> to vector<16x32xf32>
    %cst_23 = arith.constant dense<0.000000e+00> : vector<4x32xf32>
    %26 = tpu.matmul %13, %23, %cst_23 {dimension_numbers = #tpu.dot_dimension_numbers<[1], [0], [0], [1], [0, 0, 1, 1], [], []>} : vector<4x16xf32>, vector<16x32xf32>, vector<4x32xf32> -> vector<4x32xf32>
    %cst_24 = arith.constant dense<0.000000e+00> : vector<4x32xf32>
    %27 = tpu.matmul %20, %25, %cst_24 {dimension_numbers = #tpu.dot_dimension_numbers<[1], [0], [0], [1], [0, 0, 1, 1], [], []>} : vector<4x16xf32>, vector<16x32xf32>, vector<4x32xf32> -> vector<4x32xf32>
    %28 = arith.addf %26, %27 : vector<4x32xf32>
    %29 = vector.broadcast %21 : vector<4x1xf32> to vector<4x32xf32>
    %30 = arith.addf %28, %29 : vector<4x32xf32>
    %c0_25 = arith.constant 0 : index
    %c0_26 = arith.constant 0 : index
    %c0_27 = arith.constant 0 : index
    %31 = vector.load %arg5[%c0_25, %c0_26, %c0_27] : memref<1x4x32xf32, #tpu.memory_space<vmem>>, vector<1x4x32xf32>
    %32 = vector.shape_cast %31 : vector<1x4x32xf32> to vector<4x32xf32>
    %33 = vector.shape_cast %30 : vector<4x32xf32> to vector<1x4x32xf32>
    tpu.vector_store %arg5[%c0_25, %c0_26, %c0_27], %33 {strides = array<i32>} : memref<1x4x32xf32, #tpu.memory_space<vmem>>, vector<1x4x32xf32>,
    return
  }
  func.func @transform_0(%arg0: i32) -> (i32, i32, i32) {
    %c0_i32 = arith.constant 0 : i32
    %c0_i32_0 = arith.constant 0 : i32
    %c0_i32_1 = arith.constant 0 : i32
    return %arg0, %c0_i32, %c0_i32_0 : i32, i32, i32
  }
  func.func @transform_1(%arg0: i32) -> (i32, i32, i32) {
    %c0_i32 = arith.constant 0 : i32
    %c0_i32_0 = arith.constant 0 : i32
    %c0_i32_1 = arith.constant 0 : i32
    %c0_i32_2 = arith.constant 0 : i32
    return %c0_i32, %c0_i32_0, %c0_i32_1 : i32, i32, i32
  }
  func.func @transform_2(%arg0: i32) -> (i32, i32) {
    %c0_i32 = arith.constant 0 : i32
    %c0_i32_0 = arith.constant 0 : i32
    %c0_i32_1 = arith.constant 0 : i32
    return %c0_i32, %c0_i32_0 : i32, i32
  }
  func.func @transform_3(%arg0: i32) -> (i32, i32, i32) {
    %c0_i32 = arith.constant 0 : i32
    %c0_i32_0 = arith.constant 0 : i32
    %c0_i32_1 = arith.constant 0 : i32
    %c0_i32_2 = arith.constant 0 : i32
    return %c0_i32, %c0_i32_0, %c0_i32_1 : i32, i32, i32
  }
  func.func @transform_4(%arg0: i32) -> (i32, i32, i32) {
    %c0_i32 = arith.constant 0 : i32
    %c0_i32_0 = arith.constant 0 : i32
    %c0_i32_1 = arith.constant 0 : i32
    return %arg0, %c0_i32, %c0_i32_0 : i32, i32, i32
  }
}

</mosaic_0001>

<bundles_post_ra>
// kernel: tpu_custom_call.1
= control target key start
LH: loop header
LB: loop body
LE: loop exit
PB: predicated region body
PF: predicated region fallthrough
CT: control target
= control target key end

     0   :  { %9 = vsyncpa [#allocation3], 0  ;;  %s1437_s0 = inlined_call_operand.hbm [shape: f32[2,4,16], index: 0, kind: input, shape index: {}]   ;;  %s1438_s1 = inlined_call_operand.hbm [shape: f32[4,4,4], index: 1, kind: input, shape index: {}]   ;;  %s1439_s2 = inlined_call_operand.vmem [shape: f32[4,1], index: 2, kind: input, shape index: {}]   ;;  %s1440_s3 = inlined_call_operand.hbm [shape: f32[2,16,32], index: 3, kind: input, shape index: {}]   ;;  %s1441_s4 = inlined_call_operand.hbm [shape: f32[2,4,32], index: 4, kind: output, shape index: {}]  }
   0x1   :  { %11 = vsyncpa [#allocation3 + $0x1], 0 }
   0x2   :  { %12 = vsyncpa [#allocation6], 0 }
   0x3   :  { %13 = vsyncpa [#allocation4], 0 }
   0x4   :  { %15 = vsyncpa [#allocation4 + $0x1], 0  ;;  %s1187_s15 = smov 0   ;;  %s1189_s16 = smov 0  }
   0x5   :  { %s1191_s17 = smov 0   ;;  %s1193_s18 = smov 0  }
   0x6 LB: > { %s1208_s19 = sadd.s32 4294967295, %s1146_s18   ;;  %s827_s20 = sadd.s32 4294967294, %s1146_s18   ;;  %s1146_s18 = sphi %s1193_s18, %s1461_s18   ;;  %s1142_s17 = sphi %s1191_s17, %s1460_s17   ;;  %s1138_s16 = sphi %s1189_s16, %s1459_s16   ;;  %s1134_s15 = sphi %s1187_s15, %s1458_s15  }
   0x7   : > { %p41_p0 = scmp.ne.s32.totalorder %s1138_s16, %s1134_s15  ;;  %p1442_p1 = scmp.eq.s32.totalorder %s1208_s19, 0 }
   0x8   : > { %p134_p3 = scmp.eq.s32.totalorder %s827_s20, 1  ;;  %p828_p5 = scmp.ge.s32.totalorder %s1146_s18, 1 }
   0x9   : > { %p1217_p4 = por %p1442_p1, %p41_p0  ;;  %p141_p7 = scmp.lt.s32.totalorder %s1146_s18, 3 }
   0xa   : > { %p1222_p6 = por %p134_p3, %p41_p0  ;;  %s1148_s24 = smov [#allocation5]  }
   0xb   : > { %s1445_s21 = scalar_select %p1217_p4, 1, 0 }
   0xc   : > { %s1446_s22 = scalar_select %p1222_p6, 1, 0 }
   0xd   : > { %p1227_p8 = pnand %p828_p5, %p141_p7  ;;  %s153_s25 = sshll.u32 %s1148_s24, 4  ;;  %s1231_s25 = int_to_ptr.vmem [resolvable:$true] %s153_s25 }
   0xe   : > { %s1149_s27 = smov [#allocation7]   ;;  %s990_s5 = scalar_lea.hbm %s1438_s1, 256 }
   0xf   : > { %p923_p9 = pneg %p1227_p8  ;;  %s169_s28 = sshll.u32 %s1149_s27, 4  ;;  %s1242_s28 = int_to_ptr.vmem [resolvable:$true] %s169_s28 }
  0x10   : > { %p991_p12 = scmp.ne.s32.totalorder %s1438_s1, %s990_s5  ;;  %p997_p5 = scmp.lt.u32.totalorder %s990_s5, %s1438_s1 }
  0x11   : > { %p1238_p11 = pnand %p923_p9, %p1442_p1 }
  0x13   : > { %p992_p13 = pneg %p1238_p11 }
  0x15   : > { %p993_p0 = pnand %p992_p13, %p991_p12 }
  0x17   : > { %p994_p3 = pneg %p993_p0 }
  0x19   : > { %p999_p7 = pnand %p997_p5, %p994_p3 }
  0x1b   : > { %1002 = shalt.err (!%p999_p7)
}
  0x1c   : > { %s1003_s10 = scalar_lea.vmem %s1231_s25, 256  ;;  %p1011_p2 = scmp.lt.s32.totalorder %s1231_s25, %s1231_s25 }
  0x1d   : > { %p1004_p9 = scmp.ne.s32.totalorder %s1231_s25, %s1003_s10  ;;  %p1012_p12 = scmp.lt.s32.totalorder %s1003_s10, %s1003_s10 }
  0x1f   : > { %p1006_p10 = pnand %p1004_p9, %p992_p13  ;;  %p1013_p0 = por %p1012_p12, %p1011_p2 }
  0x21   : > { %p1007_p1 = pneg %p1006_p10 }
  0x23   : > { %p1014_p6 = pnand %p1013_p0, %p1007_p1 }
  0x25   : > { %1017 = shalt.err (!%p1014_p6)
}
  0x26   : > { %s1150_s11 = smov 64   ;;  %s1151_s12 = smov 4  }
  0x27   : > { %926 = dma.hbm_to_vmem [thread:$0]  (!%p1238_p11), %s1438_s1, 256, %s1231_s25, [#allocation6], %s1150_s11, %s1150_s11, %s1151_s12  }
  0x28   : > { %s1018_s27 = scalar_lea.hbm %s1440_s3, 512 }
  0x29   : > { %p1019_p2 = scmp.ne.s32.totalorder %s1440_s3, %s1018_s27  ;;  %p1025_p10 = scmp.lt.u32.totalorder %s1018_s27, %s1440_s3 }
  0x2b   : > { %p1021_p1 = pnand %p1019_p2, %p992_p13 }
  0x2d   : > { %p1022_p6 = pneg %p1021_p1 }
  0x2f   : > { %p1027_p3 = pnand %p1025_p10, %p1022_p6 }
  0x31   : > { %1030 = shalt.err (!%p1027_p3)
}
  0x32   : > { %s1031_s25 = scalar_lea.vmem %s1242_s28, 512  ;;  %p1039_p12 = scmp.lt.s32.totalorder %s1242_s28, %s1242_s28 }
  0x33   : > { %p1032_p5 = scmp.ne.s32.totalorder %s1242_s28, %s1031_s25  ;;  %p1040_p0 = scmp.lt.s32.totalorder %s1031_s25, %s1031_s25 }
  0x35   : > { %p1034_p7 = pnand %p1032_p5, %p992_p13  ;;  %p1041_p2 = por %p1040_p0, %p1039_p12 }
  0x37   : > { %p1035_p9 = pneg %p1034_p7 }
  0x39   : > { %p1042_p1 = pnand %p1041_p2, %p1035_p9 }
  0x3b   : > { %1045 = shalt.err (!%p1042_p1)
}
  0x3c   : > { %s1152_s7 = smov 128   ;;  %s1153_s8 = smov 8  }
  0x3d   : > { %929 = dma.hbm_to_vmem [thread:$0]  (!%p1238_p11), %s1440_s3, 512, %s1242_s28, [#allocation6], %s1152_s7, %s1152_s7, %s1153_s8  }
  0x3e   : > { %s1297_s11 = sadd.s32 1, %s1146_s18   ;;  %s28_s13 = sadd.s32 1, %s1142_s17 }
  0x3f   : > { %s25_s12 = ssub.s32 %s1146_s18, %s1297_s11  ;;  %p35_p6 = scmp.ne.s32.totalorder %s1142_s17, %s1138_s16 }
  0x40   : > { %p26_p13 = scmp.eq.s32.totalorder %s25_s12, 0  ;;  %p36_p10 = scmp.eq.s32.totalorder %s1146_s18, 0 }
  0x41   : > { %p1449_p5 = scmp.eq.s32.totalorder %s1208_s19, 1  ;;  %p940_p9 = scmp.lt.s32.totalorder %s1146_s18, 2 }
  0x42   : > { %s1306_s14 = scalar_select %p26_p13, %s1142_s17, %s28_s13  }
  0x43   : > { %p37_p3 = por %p36_p10, %p35_p6  ;;  %p1310_p7 = por %p1449_p5, %p35_p6 }
  0x44   : > { %s183_s26 = sand.u32 1, %s1142_s17   ;;  %s833_s28 = sshll.u32 %s1146_s18, 6 }
  0x45   : > { %s1450_s20 = scalar_select %p1310_p7, 1, 0 }
  0x46   : > { %s832_s24 = sshll.u32 %s183_s26, 2  ;;  %s1320_s30 = scalar_lea.hbm %s1437_s0, %s833_s28 }
  0x47   : > { %s187_s5 = scalar_lea.vmem [#allocation2], %s832_s24  ;;  %p1324_p11 = pnand %p940_p9, %p37_p3 }
  0x48   : > { %s194_s6 = sshll.u32 %s187_s5, 4  ;;  %s184_s7 = scalar_lea.sflag [#allocation3], %s183_s26  ;;  %s1322_s6 = int_to_ptr.vmem [resolvable:$true] %s194_s6 }
  0x49   : > { %s1046_s8 = scalar_lea.hbm %s1320_s30, 64  ;;  %p1048_p0 = pneg %p1324_p11 }
  0x4a   : > { %p1047_p12 = scmp.ne.s32.totalorder %s1320_s30, %s1046_s8  ;;  %s1051_s12 = scalar_lea.hbm %s1437_s0, 128 }
  0x4b   : > { %p1052_p13 = scmp.lt.u32.totalorder %s1320_s30, %s1437_s0  ;;  %p1053_p6 = scmp.lt.u32.totalorder %s1051_s12, %s1046_s8 }
  0x4c   : > { %p1049_p2 = pnand %p1048_p0, %p1047_p12  ;;  %p1055_p3 = scmp.lt.u32.totalorder %s1046_s8, %s1320_s30 }
  0x4d   : > { %p1054_p10 = por %p1053_p6, %p1052_p13 }
  0x4e   : > { %p1050_p1 = pneg %p1049_p2 }
  0x4f   : > { %p1056_p5 = por %p1055_p3, %p1054_p10 }
  0x51   : > { %p1057_p9 = pnand %p1056_p5, %p1050_p1 }
  0x53   : > { %1060 = shalt.err (!%p1057_p9)
}
  0x54   : > { %s1061_s26 = scalar_lea.vmem %s1322_s6, 64  ;;  %s1154_s28 = smov [#allocation2]  }
  0x55   : > { %p1062_p12 = scmp.ne.s32.totalorder %s1322_s6, %s1061_s26  ;;  %s1066_s27 = sshll.u32 %s1154_s28, 4  ;;  %s1067_s27 = int_to_ptr.vmem [resolvable:$false] %s1066_s27 }
  0x56   : > { %s1068_s29 = scalar_lea.vmem %s1067_s27, 128  ;;  %p1069_p4 = scmp.lt.s32.totalorder %s1322_s6, %s1067_s27 }
  0x57   : > { %p1064_p2 = pnand %p1062_p12, %p1048_p0  ;;  %p1070_p13 = scmp.lt.s32.totalorder %s1068_s29, %s1061_s26 }
  0x59   : > { %p1065_p7 = pneg %p1064_p2  ;;  %p1071_p6 = por %p1070_p13, %p1069_p4 }
  0x5b   : > { %p1072_p10 = pnand %p1071_p6, %p1065_p7 }
  0x5d   : > { %1075 = shalt.err (!%p1072_p10)
}
  0x5e   : > { %933 = dma.hbm_to_vmem [thread:$0]  (!%p1324_p11), %s1320_s30, 64, %s1322_s6, %s184_s7  }
  0x5f   : > { %203 = sbr.rel (%p1227_p8) target bundleno = 676 (0x2a4), region = 36  ;;  %s1356_s5 = sand.u32 (!%p1227_p8), 1, %s1138_s16  }
  0x60   : > { %s835_s8 = sshll.u32 (!%p1227_p8), %s1356_s5, 2  ;;  %s206_s9 = scalar_lea.sflag (!%p1227_p8), [#allocation3], %s1356_s5 }
  0x61   : > { %s209_s10 = scalar_lea.vmem (!%p1227_p8), [#allocation2], %s835_s8  ;;  %p1452_p4 = scmp.ne.s32.totalorder (!%p1227_p8), %s1445_s21, 0 }
  0x66   : > { %1121 = dma.done.wait (%p1452_p4), %s206_s9, 64  }
  0x67   : > { %1123 = vsyncadd (%p1452_p4), %s206_s9, 4294967232  ;;  %p1453_p7 = scmp.eq.s32.totalorder %s1208_s19, 0 }
  0x69   : > { %1125 = dma.done.wait (%p1453_p7), [#allocation6], 768   ;;  %p1454_p8 = pmov %p1453_p7 }
  0x6a   : > { %v1155_v0 = vmov 0.0   ;;  %vm1156_vm0 = vmmov 0   ;;  %vm261_vm1 = vcmask 1043456   ;;  %vm257_vm2 = vcmask 31744   ;;  %v242_v1 = vld [vmem:[%s209_s10] sm:$0xf] }
  0x6b   : > { %1127 = vsyncadd (%p1454_p8), [#allocation6], 4294966528  ;;  %867 = vmatprep.subr.mxu0 %v1155_v0  ;;  %877 = vmatprep.subr.mxu1 %v1155_v0  ;;  %v256_v2 = vld [vmem:[#allocation5 + $0x4] sm:$0xf]  ;;  %s1157_s21 = smov 127   ;;  %s1158_s23 = smov 1  }
  0x6c   : > { %869 = vmatprep.mubr.msk.f32.mxu0 %vm1156_vm0, %v1155_v0  ;;  %879 = vmatprep.mubr.msk.f32.mxu1 %vm1156_vm0, %v1155_v0  ;;  %vm252_vm3 = vcmask 121856   ;;  %v413_v4 = vld [vmem:[#allocation5 + $0xc] sm:$0xf]  ;;  %vm247_vm4 = vcmask 7168   ;;  %v254_v7 = vld [vmem:[#allocation5] sm:$0xf] }
  0x6d   : > { %249 = vrot.lane.b32.xlu0 %v242_v1, %s1157_s21  ;;  %868 = vmatpush3.msk.msra.mxu0 %vm261_vm1, %v242_v1  ;;  %v1159_v9 = vmov 0.0|0.0   ;;  %v564_v10 = vld [vmem:[#allocation7] sm:$0xff]  ;;  %v565_v11 = vld [vmem:[#allocation7 + $0x8] sm:$0xff]  ;;  %v411_v12 = vld [vmem:[#allocation5 + $0x8] sm:$0xf]  ;;  %v1160_v18 = vmov 0  }
  0x6e   : > { %870 = vmatmul.mubr.msk.f32.vlgmr.msra.gmra.mrb[0].mxu0 %vm257_vm2, %v256_v2  ;;  %872 = vmatprep.subr.mxu0 %v1155_v0  ;;  %v905_v13 = vpack.c.bf16 %v565_v11, %v564_v10  ;;  %v567_v14 = vld [vmem:[#allocation7 + $0x10] sm:$0xff]  ;;  %v568_v15 = vld [vmem:[#allocation7 + $0x18] sm:$0xff]  ;;  %v563_v17 = vld [vmem:[%s1439_s2] sm:$0xf]  ;;  %vm569_vm5 = vcmask 130048   ;;  %s850_s25 = sshll.u32 %s1208_s19, 6 }
  0x6f   : > { %874 = vmatprep.mubr.msk.f32.mxu0 %vm1156_vm0, %v1155_v0  ;;  %v902_v16 = vpack.c.bf16 %v568_v15, %v567_v14  ;;  %988 = vset.pattern.permute.xlu1 %v1160_v18  ;;  %s241_s7 = scalar_lea.vmem [#allocation8], %s835_s8  ;;  %vm722_vm6 = vcmask 257024   ;;  %s1393_s26 = scalar_lea.hbm %s1441_s4, %s850_s25 }
  0x70   : > { %989 = vset.pattern.permute.xlu0 %v1160_v18  ;;  %718 = vperm.xlu1 %988, %v563_v17   ;;  %s738_s12 = sshll.u32 %s241_s7, 4  ;;  %s725_s28 = scalar_lea.sflag [#allocation4], %s1356_s5  ;;  %s1395_s12 = int_to_ptr.vmem [resolvable:$true] %s738_s12 }
  0x71   : > { %244 = vrot.lane.b32.xlu0 %v242_v1, %s1158_s23  ;;  %s1076_s19 = scalar_lea.vmem %s1395_s12, 64  ;;  %p1455_p0 = scmp.ne.s32.totalorder %s1450_s20, 0 }
  0x72   : > { %p1077_p11 = scmp.ne.s32.totalorder %s1395_s12, %s1076_s19  ;;  %s1161_s27 = smov [#allocation8]  }
  0x73   : > { %s1080_s29 = sshll.u32 %s1161_s27, 4  ;;  %s1081_s29 = int_to_ptr.vmem [resolvable:$false] %s1080_s29 }
  0x74   : > { %p1078_p1 = pnand %p1077_p11, %p1455_p0  ;;  %s1082_s8 = scalar_lea.vmem %s1081_s29, 128 }
  0x75   : > { %p1083_p5 = scmp.lt.s32.totalorder %s1395_s12, %s1081_s29  ;;  %p1084_p9 = scmp.lt.s32.totalorder %s1082_s8, %s1076_s19 }
  0x76   : > { %p1079_p3 = pneg %p1078_p1 }
  0x77   : > { %p1085_p12 = por %p1084_p9, %p1083_p5 }
  0x79   : > { %p1086_p2 = pnand %p1085_p12, %p1079_p3 }
  0xdf   : > { %v250_v3 = vpop.permute.xlu0 %249 }
  0xe0   : > { %v253_v5 = vsel %vm252_vm3, %v250_v3, 0.0 }
  0xe1   : > { %878 = vmatpush3.msk.msra.mxu1 %vm261_vm1, %v253_v5 }
  0xe2   : > { %880 = vmatmul.mubr.msk.f32.vlgmr.msra.gmra.mrb[0].mxu1 %vm257_vm2, %v413_v4  ;;  %882 = vmatprep.subr.mxu1 %v1155_v0 }
  0xe3   : > { %v245_v6 = vpop.permute.xlu0 %244  ;;  %883 = vmatpush3.msk.msra.mxu1 %vm261_vm1, %v242_v1  ;;  %884 = vmatprep.mubr.msk.f32.mxu1 %vm1156_vm0, %v1155_v0 }
  0xe4   : > { %v248_v8 = vsel %vm247_vm4, 0.0, %v245_v6  ;;  %904 = vmatprep.subr.bf16.mxu1 %v1159_v9 }
  0xe5   : > { %873 = vmatpush3.msk.msra.mxu0 %vm261_vm1, %v248_v8 }
  0xe6   : > { %875 = vmatmul.mubr.msk.f32.vlgmr.msra.gmra.mrb[0].mxu0 %vm257_vm2, %v254_v7  ;;  %901 = vmatprep.subr.bf16.mxu0 %v1159_v9 }
  0xe7   : > { %891 = vmatprep.mubr.msk.f32.mxu0 %vm1156_vm0, %v1155_v0  ;;  %903 = vmatpush3.bf16.msra.mxu0 %v902_v16 }
  0xea   : > { %885 = vmatmul.mubr.msk.f32.vlgmr.msra.gmra.mrb[0].mxu1 %vm257_vm2, %v411_v12 }
  0xeb   : > { %906 = vmatpush3.bf16.msra.mxu1 %v905_v13  ;;  %898 = vmatprep.mubr.msk.f32.mxu1 %vm1156_vm0, %v1155_v0 }
  0xef   : > { %v719_v26 = vpop.permute.xlu1 %718 }
 0x1b9   : > { %v406_v19 = vpop.f32.mrb[0].mxu0 }
 0x1ba   : > { %v876_v20 = vpop.f32.mrb[1].mxu0  ;;  %899 = vmatmul.mubr.msk.f32.vlgmr.msra.gmra.mrb[2].mxu1 %vm569_vm5, %v406_v19 }
 0x1bd   : > { %v559_v21 = vpop.f32.mrb[0].mxu1 }
 0x1be   : > { %v886_v22 = vpop.f32.mrb[1].mxu1  ;;  %892 = vmatmul.mubr.msk.f32.vlgmr.msra.gmra.mrb[2].mxu0 %vm569_vm5, %v559_v21 }
 0x28d   : > { %v712_v23 = vpop.f32.mrb[2].mxu1 }
 0x28e   : > { %v900_v24 = vpop.f32.mrb[3].mxu1 }
 0x291   : > { %v639_v25 = vpop.f32.mrb[2].mxu0 }
 0x292   : > { %v713_v27 = vadd.f32 %v712_v23, %v639_v25  ;;  %v893_v28 = vpop.f32.mrb[3].mxu0 }
 0x294   : > { %v721_v29 = vadd.f32 %v719_v26, %v713_v27 }
 0x296   : > { %723 = vst.msk [vmem:[%s241_s7] sm:$0xf] %vm722_vm6, %v721_v29 }
 0x297   : > { %1089 = shalt.err (!%p1086_p2)
}
 0x298   : > { %s1090_s5 = scalar_lea.hbm %s1393_s26, 64  ;;  %s1094_s21 = scalar_lea.hbm %s1441_s4, 128 }
 0x299   : > { %p1091_p13 = scmp.ne.s32.totalorder %s1393_s26, %s1090_s5  ;;  %p1095_p4 = scmp.lt.u32.totalorder %s1393_s26, %s1441_s4 }
 0x29a   : > { %p1096_p7 = scmp.lt.u32.totalorder %s1094_s21, %s1090_s5  ;;  %p1098_p11 = scmp.lt.u32.totalorder %s1090_s5, %s1393_s26 }
 0x29b   : > { %p1092_p6 = pnand %p1091_p13, %p1455_p0 }
 0x29c   : > { %p1097_p8 = por %p1096_p7, %p1095_p4 }
 0x29d   : > { %p1093_p10 = pneg %p1092_p6 }
 0x29e   : > { %p1099_p1 = por %p1098_p11, %p1097_p8 }
 0x2a0   : > { %p1100_p3 = pnand %p1099_p1, %p1093_p10 }
 0x2a2   : > { %1103 = shalt.err (!%p1100_p3)
}
 0x2a3   : > { %921 = dma.vmem_to_hbm [thread:$0]  (%p1455_p0), %s1395_s12, 64, %s1393_s26, %s725_s28  }
 0x2a4 PF: > { %s750_s6 = sand.u32 1, %s1134_s15   ;;  %p1456_p5 = scmp.ne.s32.totalorder %s1446_s22, 0 }
 0x2a5   : > { %p1457_p9 = scmp.ge.s32.totalorder %s1146_s18, 2  ;;  %s751_s25 = scalar_lea.sflag [#allocation4], %s750_s6 }
 0x2a7   : > { %p935_p12 = pnand %p1457_p9, %p1456_p5 }
 0x2a9   : > { %1129 = dma.done.wait (!%p935_p12), %s751_s25, 64  }
 0x2aa   : > { %1131 = vsyncadd (!%p935_p12), %s751_s25, 4294967232  ;;  %p18_p2 = scmp.ge.s32.totalorder %s1297_s11, 4   ;;  %s1458_s15 = smov %s1138_s16 }
 0x2ab   : > { %s1459_s16 = smov %s1142_s17  ;;  %s1460_s17 = smov %s1306_s14 }
 0x2ac   : > { %s1461_s18 = smov %s1297_s11  ;;  %20 = sbr.rel (!%p18_p2) target bundleno = 6 (0x6), region = 93 }
 0x2b3   :  { %756 = vsyncpa [#allocation3], 1 }
 0x2b4   :  { %758 = vsyncpa [#allocation3 + $0x1], 1 }
 0x2b5   :  { %759 = vsyncpa [#allocation6], 1 }
 0x2b6   :  { %760 = vsyncpa [#allocation4], 1 }
 0x2b7   :  { %762 = vsyncpa [#allocation4 + $0x1], 1 }

</bundles_post_ra>
